<compile_context>
chip_gen: v7x
topology: tpu7x:2x2x1
jax: 0.10.0
libtpu: 0.0.40
codegen_flags: <defaults>
</compile_context>

<pallas_src>
import math
import functools

import jax
import jax.numpy as jnp
from jax.experimental import pallas as pl
from jax.experimental.pallas import tpu as pltpu


def _round_up(a: int, b: int) -> int:
    return (a + b - 1) // b * b


def simple_dqn_kernel(x_ref, w1_ref, b1_ref, w2_ref, b2_ref, out_ref, *, num_actions):
    # x_ref:  (TB, D_in)     f32   (raw activation stream; bf16 cast done here, in vregs)
    # w1_ref: (D_in, H_pad)  bf16  (constant index_map -> resident across grid steps)
    # b1_ref: (1, H_pad)     f32   resident
    # w2_ref: (H_pad, A_pad) bf16  resident
    # b2_ref: (1, A_pad)     f32   resident
    # out_ref:(TB, A_pad)    bf16  (lane-dense 128-wide => unmasked full-width vst)
    x = x_ref[...].astype(w1_ref.dtype)

    # Linear 1 + ReLU: bf16 MXU matmul, f32 accumulate, f32 elementwise.
    h = jnp.dot(x, w1_ref[...], preferred_element_type=jnp.float32) + b1_ref[...]
    h = jnp.maximum(h, 0.0)

    # Linear 2 (cast activations back to bf16 for the MXU).
    logits = jnp.dot(h.astype(w2_ref.dtype), w2_ref[...],
                     preferred_element_type=jnp.float32) + b2_ref[...]

    # Mask padded action lanes so they vanish under softmax.
    lane = jax.lax.broadcasted_iota(jnp.int32, logits.shape, dimension=1)
    logits = jnp.where(lane < num_actions, logits, -1e30)

    # Numerically stable softmax over the lane (action) dim.  Exact normalization in
    # f32 (the approx reciprocal only normalizes to ~1e-3; cost here is negligible).
    m = jnp.max(logits, axis=-1, keepdims=True)
    e = jnp.exp(logits - m)
    denom = jnp.sum(e, axis=-1, keepdims=True)
    out_ref[...] = (e / denom).astype(out_ref.dtype)


def prepare_params(params, *, hidden_pad=128, action_pad=128):
    """One-time packing of the (static) weights into padded, MXU-friendly layouts.

    Call once at init; the hot-path forward only consumes the prepared tuple.
    Zero-padding of the extra hidden/action columns/rows is exact (contributes 0).
    """
    w1, b1, w2, b2 = params
    d_in, hidden = w1.shape
    num_actions = w2.shape[1]

    w1_p = jnp.zeros((d_in, hidden_pad), jnp.float32).at[:, :hidden].set(w1).astype(jnp.bfloat16)
    b1_p = jnp.zeros((1, hidden_pad), jnp.float32).at[:, :hidden].set(b1.reshape(1, hidden))
    w2_p = (jnp.zeros((hidden_pad, action_pad), jnp.float32)
            .at[:hidden, :num_actions].set(w2).astype(jnp.bfloat16))
    b2_p = jnp.zeros((1, action_pad), jnp.float32).at[:, :num_actions].set(b2.reshape(1, num_actions))
    return (w1_p, b1_p, w2_p, b2_p, num_actions)


def _pick_batch_tile(B: int, max_tile: int) -> int:
    """Batch tile: full dim for tiny batches; otherwise a multiple of 8 that gives at
    least 2 grid steps (v7x megacore) and wastes < one tile via the partial last block."""
    if B <= 8:
        return B  # block equals the full batch dim (legal for any B)
    tb = _round_up(pl.cdiv(B, 2), 8)
    return min(max_tile, tb)


def simple_dqn_forward(x_nchw, prepared, *, max_tile=1024):
    """x_nchw: (B, C, H, W) float32 -> (B, num_actions) float32 action distribution."""
    w1_p, b1_p, w2_p, b2_p, num_actions = prepared
    B = x_nchw.shape[0]
    d_in = w1_p.shape[0]
    h_pad = w1_p.shape[1]
    a_pad = w2_p.shape[1]

    # Plain reshape only: no pad / cast / extra HBM pass over the activation stream.
    x2d = x_nchw.reshape(B, d_in)

    TB = _pick_batch_tile(B, max_tile)
    grid = (pl.cdiv(B, TB),)  # partial last block: tail rows are masked on store

    kernel = functools.partial(simple_dqn_kernel, num_actions=num_actions)

    out_padded = pl.pallas_call(
        kernel,
        out_shape=jax.ShapeDtypeStruct((B, a_pad), jnp.bfloat16),
        grid=grid,
        in_specs=[
            pl.BlockSpec((TB, d_in), lambda i: (i, 0)),     # batch-tiled activations (f32)
            pl.BlockSpec((d_in, h_pad), lambda i: (0, 0)),  # W1 resident (bf16)
            pl.BlockSpec((1, h_pad), lambda i: (0, 0)),     # b1 resident (f32)
            pl.BlockSpec((h_pad, a_pad), lambda i: (0, 0)), # W2 resident (bf16)
            pl.BlockSpec((1, a_pad), lambda i: (0, 0)),     # b2 resident (f32)
        ],
        out_specs=pl.BlockSpec((TB, a_pad), lambda i: (i, 0)),
        compiler_params=pltpu.CompilerParams(
            dimension_semantics=("parallel",),   # batch steps shard across TCs (v7x)
            vmem_limit_bytes=32 * 1024 * 1024,   # ample headroom at TB<=1024 on all gens
        ),
    )(x2d, w1_p, b1_p, w2_p, b2_p)

    # Strip action padding (plain-JAX glue); return f32 probabilities.
    return out_padded[:, :num_actions].astype(jnp.float32)


def init_params(key, input_shape=(8, 7, 7), num_actions=6):
    """Deterministic PyTorch-style (default Linear) init, unpadded shapes."""
    d_in = math.prod(input_shape)
    hidden = 64
    k1, k2, k3, k4 = jax.random.split(key, 4)

    bound1 = 1.0 / math.sqrt(d_in)
    w1 = jax.random.uniform(k1, (d_in, hidden), jnp.float32, -bound1, bound1)
    b1 = jax.random.uniform(k2, (1, hidden), jnp.float32, -bound1, bound1)

    bound2 = 1.0 / math.sqrt(hidden)
    w2 = jax.random.uniform(k3, (hidden, num_actions), jnp.float32, -bound2, bound2)
    b2 = jax.random.uniform(k4, (1, num_actions), jnp.float32, -bound2, bound2)
    return (w1, b1, w2, b2)


if __name__ == "__main__":
    key = jax.random.PRNGKey(0)
    kx, kp = jax.random.split(key)

    input_shape = (8, 7, 7)   # (C, H, W) as in the module default => d_in = 392
    num_actions = 6
    B = 2

    x = jax.random.normal(kx, (B,) + input_shape, dtype=jnp.float32)
    params = init_params(kp, input_shape, num_actions)
    prepared = prepare_params(params)          # one-time weight packing (off the hot path)

    out = simple_dqn_forward(x, prepared)
    out = jax.block_until_ready(out)

    # Sanity: shape and row-normalization (exact f32 division, bf16 store => ~2e-3 rounding).
    assert out.shape == (B, num_actions)
    assert bool(jnp.allclose(jnp.sum(out, axis=1), 1.0, atol=1e-2))

    # Cross-check against a pure-JAX f32 reference (bf16 matmul/operands => relaxed tol).
    w1, b1, w2, b2 = params
    h_ref = jnp.maximum(x.reshape(B, -1) @ w1 + b1, 0.0)
    logits_ref = h_ref @ w2 + b2
    ref = jax.nn.softmax(logits_ref, axis=1)
    assert bool(jnp.allclose(out, ref, atol=2e-2, rtol=2e-2))

    print("KERNEL_OK")
</pallas_src>

<mosaic_0001>
module attributes {stable_mosaic.version = 11 : i64} {
  func.func @simple_dqn_kernel(%arg0: i32, %arg1: memref<2x392xf32, #tpu.memory_space<vmem>>, %arg2: memref<392x128xbf16, #tpu.memory_space<vmem>>, %arg3: memref<1x128xf32, #tpu.memory_space<vmem>>, %arg4: memref<128x128xbf16, #tpu.memory_space<vmem>>, %arg5: memref<1x128xf32, #tpu.memory_space<vmem>>, %arg6: memref<2x128xbf16, #tpu.memory_space<vmem>>) attributes {dimension_semantics = [#tpu.dimension_semantics<parallel>], iteration_bounds = array<i64: 1>, scalar_prefetch = 0 : i64, scratch_operands = 0 : i64, tpu.core_type = #tpu.core_type<tc>, window_params = [{transform_indices = @transform_0, window_bounds = array<i64: 2, 392>}, {pipeline_mode = #tpu.pipeline_mode<synchronous>, transform_indices = @transform_1, window_bounds = array<i64: 392, 128>}, {pipeline_mode = #tpu.pipeline_mode<synchronous>, transform_indices = @transform_2, window_bounds = array<i64: 1, 128>}, {pipeline_mode = #tpu.pipeline_mode<synchronous>, transform_indices = @transform_3, window_bounds = array<i64: 128, 128>}, {pipeline_mode = #tpu.pipeline_mode<synchronous>, transform_indices = @transform_4, window_bounds = array<i64: 1, 128>}, {transform_indices = @transform_5, window_bounds = array<i64: 2, 128>}]} {
    %c0 = arith.constant 0 : index
    %c0_0 = arith.constant 0 : index
    %0 = vector.load %arg1[%c0, %c0_0] : memref<2x392xf32, #tpu.memory_space<vmem>>, vector<2x392xf32>
    %1 = arith.truncf %0 : vector<2x392xf32> to vector<2x392xbf16>
    %c0_1 = arith.constant 0 : index
    %c0_2 = arith.constant 0 : index
    %2 = vector.load %arg2[%c0_1, %c0_2] : memref<392x128xbf16, #tpu.memory_space<vmem>>, vector<392x128xbf16>
    %cst = arith.constant dense<0.000000e+00> : vector<2x128xf32>
    %3 = tpu.matmul %1, %2, %cst {dimension_numbers = #tpu.dot_dimension_numbers<[1], [0], [0], [1], [0, 0, 1, 1], [], []>} : vector<2x392xbf16>, vector<392x128xbf16>, vector<2x128xf32> -> vector<2x128xf32>
    %c0_3 = arith.constant 0 : index
    %c0_4 = arith.constant 0 : index
    %4 = vector.load %arg3[%c0_3, %c0_4] : memref<1x128xf32, #tpu.memory_space<vmem>>, vector<1x128xf32>
    %5 = vector.broadcast %4 : vector<1x128xf32> to vector<2x128xf32>
    %6 = arith.addf %3, %5 : vector<2x128xf32>
    %cst_5 = arith.constant 0.000000e+00 : f32
    %7 = vector.broadcast %cst_5 : f32 to vector<2x128xf32>
    %8 = arith.maximumf %6, %7 : vector<2x128xf32>
    %9 = arith.truncf %8 : vector<2x128xf32> to vector<2x128xbf16>
    %c0_6 = arith.constant 0 : index
    %c0_7 = arith.constant 0 : index
    %10 = vector.load %arg4[%c0_6, %c0_7] : memref<128x128xbf16, #tpu.memory_space<vmem>>, vector<128x128xbf16>
    %cst_8 = arith.constant dense<0.000000e+00> : vector<2x128xf32>
    %11 = tpu.matmul %9, %10, %cst_8 {dimension_numbers = #tpu.dot_dimension_numbers<[1], [0], [0], [1], [0, 0, 1, 1], [], []>} : vector<2x128xbf16>, vector<128x128xbf16>, vector<2x128xf32> -> vector<2x128xf32>
    %c0_9 = arith.constant 0 : index
    %c0_10 = arith.constant 0 : index
    %12 = vector.load %arg5[%c0_9, %c0_10] : memref<1x128xf32, #tpu.memory_space<vmem>>, vector<1x128xf32>
    %13 = vector.broadcast %12 : vector<1x128xf32> to vector<2x128xf32>
    %14 = arith.addf %11, %13 : vector<2x128xf32>
    %15 = tpu.iota {dimensions = array<i32: 1>} : vector<2x128xi32>
    %c6_i32 = arith.constant 6 : i32
    %16 = vector.broadcast %c6_i32 : i32 to vector<2x128xi32>
    %17 = arith.cmpi slt, %15, %16 : vector<2x128xi32>
    %cst_11 = arith.constant -1.000000e+30 : f32
    %18 = vector.broadcast %cst_11 : f32 to vector<2x128xf32>
    %19 = arith.select %17, %14, %18 : vector<2x128xi1>, vector<2x128xf32>
    %cst_12 = arith.constant dense<0xFF800000> : vector<2xf32>
    %20 = vector.multi_reduction <maximumf>, %19, %cst_12 [1] : vector<2x128xf32> to vector<2xf32>
    %21 = vector.shape_cast %20 : vector<2xf32> to vector<2x1xf32>
    %22 = vector.broadcast %21 : vector<2x1xf32> to vector<2x128xf32>
    %23 = arith.subf %19, %22 : vector<2x128xf32>
    %24 = math.exp %23 : vector<2x128xf32>
    %cst_13 = arith.constant dense<0.000000e+00> : vector<2xf32>
    %25 = vector.multi_reduction <add>, %24, %cst_13 [1] : vector<2x128xf32> to vector<2xf32>
    %26 = vector.shape_cast %25 : vector<2xf32> to vector<2x1xf32>
    %27 = vector.broadcast %26 : vector<2x1xf32> to vector<2x128xf32>
    %28 = arith.divf %24, %27 : vector<2x128xf32>
    %29 = arith.truncf %28 : vector<2x128xf32> to vector<2x128xbf16>
    %c0_14 = arith.constant 0 : index
    %c0_15 = arith.constant 0 : index
    %30 = vector.load %arg6[%c0_14, %c0_15] : memref<2x128xbf16, #tpu.memory_space<vmem>>, vector<2x128xbf16>
    tpu.vector_store %arg6[%c0_14, %c0_15], %29 {strides = array<i32>} : memref<2x128xbf16, #tpu.memory_space<vmem>>, vector<2x128xbf16>,
    return
  }
  func.func @transform_0(%arg0: i32) -> (i32, i32) {
    %c0_i32 = arith.constant 0 : i32
    %c0_i32_0 = arith.constant 0 : i32
    return %arg0, %c0_i32 : i32, i32
  }
  func.func @transform_1(%arg0: i32) -> (i32, i32) {
    %c0_i32 = arith.constant 0 : i32
    %c0_i32_0 = arith.constant 0 : i32
    %c0_i32_1 = arith.constant 0 : i32
    return %c0_i32, %c0_i32_0 : i32, i32
  }
  func.func @transform_2(%arg0: i32) -> (i32, i32) {
    %c0_i32 = arith.constant 0 : i32
    %c0_i32_0 = arith.constant 0 : i32
    %c0_i32_1 = arith.constant 0 : i32
    return %c0_i32, %c0_i32_0 : i32, i32
  }
  func.func @transform_3(%arg0: i32) -> (i32, i32) {
    %c0_i32 = arith.constant 0 : i32
    %c0_i32_0 = arith.constant 0 : i32
    %c0_i32_1 = arith.constant 0 : i32
    return %c0_i32, %c0_i32_0 : i32, i32
  }
  func.func @transform_4(%arg0: i32) -> (i32, i32) {
    %c0_i32 = arith.constant 0 : i32
    %c0_i32_0 = arith.constant 0 : i32
    %c0_i32_1 = arith.constant 0 : i32
    return %c0_i32, %c0_i32_0 : i32, i32
  }
  func.func @transform_5(%arg0: i32) -> (i32, i32) {
    %c0_i32 = arith.constant 0 : i32
    %c0_i32_0 = arith.constant 0 : i32
    return %arg0, %c0_i32 : i32, i32
  }
}

</mosaic_0001>

<bundles_post_ra>
// kernel: tpu_custom_call.1
= control target key start
LH: loop header
LB: loop body
LE: loop exit
PB: predicated region body
PF: predicated region fallthrough
CT: control target
= control target key end

     0   :  { %10 = vsyncpa [#allocation3], 0  ;;  %s866_s0 = inlined_call_operand.hbm [shape: f32[2,392], index: 0, kind: input, shape index: {}]   ;;  %s867_s1 = inlined_call_operand.hbm [shape: bf16[392,128], index: 1, kind: input, shape index: {}]   ;;  %s868_s2 = inlined_call_operand.vmem [shape: f32[1,128], index: 2, kind: input, shape index: {}]   ;;  %s869_s3 = inlined_call_operand.hbm [shape: bf16[128,128], index: 3, kind: input, shape index: {}]   ;;  %s870_s4 = inlined_call_operand.vmem [shape: f32[1,128], index: 4, kind: input, shape index: {}]   ;;  %s871_s5 = inlined_call_operand.hbm [shape: bf16[2,128], index: 5, kind: output, shape index: {}]  }
   0x1   :  { %11 = vsyncpa [#allocation6], 0 }
   0x2   :  { %12 = vsyncpa [#allocation4], 0  ;;  %s755_s18 = smov [#allocation5]   ;;  %s661_s22 = scalar_lea.hbm %s867_s1, 3136 }
   0x3   :  { %s28_s19 = sshll.u32 %s755_s18, 4  ;;  %p662_p0 = scmp.ne.s32.totalorder %s867_s1, %s661_s22  ;;  %s29_s19 = int_to_ptr.vmem [resolvable:$true] %s28_s19 }
   0x4   :  { %p665_p1 = scmp.lt.u32.totalorder %s661_s22, %s867_s1 }
   0x6   :  { %p667_p2 = pnand %p665_p1, %p662_p0 }
   0x8   :  { %670 = shalt.err (!%p667_p2)
}
   0x9   :  { %s671_s27 = scalar_lea.vmem %s29_s19, 3136  ;;  %p676_p4 = scmp.lt.s32.totalorder %s29_s19, %s29_s19 }
   0xa   :  { %p672_p3 = scmp.ne.s32.totalorder %s29_s19, %s671_s27  ;;  %p677_p5 = scmp.lt.s32.totalorder %s671_s27, %s671_s27 }
   0xc   :  { %p678_p6 = por %p677_p5, %p676_p4 }
   0xe   :  { %p679_p7 = pnand %p678_p6, %p672_p3 }
  0x10   :  { %682 = shalt.err (!%p679_p7)
}
  0x11   :  { %s756_s28 = smov 64   ;;  %s757_s29 = smov 4  }
  0x12   :  { %34 = dma.hbm_to_vmem [thread:$0]  %s867_s1, 3136, %s29_s19, [#allocation6], %s756_s28, %s756_s28, %s757_s29  }
  0x13   :  { %s758_s7 = smov [#allocation2]   ;;  %s759_s9 = smov [#allocation7]  }
  0x14   :  { %s19_s8 = sshll.u32 %s758_s7, 4  ;;  %s42_s10 = sshll.u32 %s759_s9, 4  ;;  %s20_s8 = int_to_ptr.vmem [resolvable:$true] %s19_s8  ;;  %s43_s10 = int_to_ptr.vmem [resolvable:$true] %s42_s10 }
  0x15   :  { %s683_s13 = scalar_lea.hbm %s866_s0, 128 }
  0x16   :  { %p684_p8 = scmp.ne.s32.totalorder %s866_s0, %s683_s13  ;;  %p687_p9 = scmp.lt.u32.totalorder %s683_s13, %s866_s0 }
  0x18   :  { %p689_p10 = pnand %p687_p9, %p684_p8 }
  0x1a   :  { %692 = shalt.err (!%p689_p10)
}
  0x1b   :  { %s693_s1 = scalar_lea.vmem %s20_s8, 128  ;;  %p698_p12 = scmp.lt.s32.totalorder %s20_s8, %s20_s8 }
  0x1c   :  { %p694_p11 = scmp.ne.s32.totalorder %s20_s8, %s693_s1  ;;  %p699_p13 = scmp.lt.s32.totalorder %s693_s1, %s693_s1 }
  0x1e   :  { %p700_p0 = por %p699_p13, %p698_p12 }
  0x20   :  { %p701_p1 = pnand %p700_p0, %p694_p11 }
  0x22   :  { %704 = shalt.err (!%p701_p1)
}
  0x23   :  { %22 = dma.hbm_to_vmem [thread:$0]  %s866_s0, 128, %s20_s8, [#allocation3]  }
  0x24   :  { %s705_s22 = scalar_lea.hbm %s869_s3, 1024 }
  0x25   :  { %p706_p2 = scmp.ne.s32.totalorder %s869_s3, %s705_s22  ;;  %p709_p3 = scmp.lt.u32.totalorder %s705_s22, %s869_s3 }
  0x27   :  { %p711_p4 = pnand %p709_p3, %p706_p2 }
  0x29   :  { %714 = shalt.err (!%p711_p4)
}
  0x2a   :  { %s715_s27 = scalar_lea.vmem %s43_s10, 1024  ;;  %p720_p6 = scmp.lt.s32.totalorder %s43_s10, %s43_s10 }
  0x2b   :  { %p716_p5 = scmp.ne.s32.totalorder %s43_s10, %s715_s27  ;;  %p721_p7 = scmp.lt.s32.totalorder %s715_s27, %s715_s27 }
  0x2d   :  { %p722_p8 = por %p721_p7, %p720_p6 }
  0x2f   :  { %p723_p9 = pnand %p722_p8, %p716_p5 }
  0x31   :  { %726 = shalt.err (!%p723_p9)
}
  0x32   :  { %48 = dma.hbm_to_vmem [thread:$0]  %s869_s3, 1024, %s43_s10, [#allocation6], %s756_s28, %s756_s28, %s757_s29  }
  0x33   :  { %749 = dma.done.wait [#allocation3], 128  }
  0x34   :  { %750 = vsyncadd [#allocation3], 4294967168 }
  0x35   :  { %751 = dma.done.wait [#allocation6], 4160  }
  0x36   :  { %752 = vsyncadd [#allocation6], 4294963136  ;;  %v760_v0 = vmov 0   ;;  %v623_v1 = vld [vmem:[#allocation5 + $0x40] sm:$0xff]   ;;  %v626_v4 = vld [vmem:[#allocation5 + $0x48] sm:$0xff]   ;;  %v67_v16 = vlaneseq  ;;  %vm295_vm0 = vcmask 1043456  }
  0x37   :  { %339 = vmatprep.subr.bf16.mxu1 %v760_v0  ;;  %v624_v2 = vld [vmem:[#allocation5 + $0x80] sm:$0xff]   ;;  %562 = vmatprep.subr.bf16.mxu0 %v623_v1  ;;  %v627_v5 = vld [vmem:[#allocation5 + $0x88] sm:$0xff]   ;;  %v629_v7 = vld [vmem:[#allocation5 + $0x50] sm:$0xff]   ;;  %v761_v14 = vmov 1983009808   ;;  %vm291_vm1 = vcmask 64512  }
  0x38   :  { %v625_v3 = vld [vmem:[#allocation5] sm:$0xff]   ;;  %340 = vmatpush1.bf16.msra.mxu1 %v624_v2  ;;  %v628_v6 = vld [vmem:[#allocation5 + $0x8] sm:$0xff]   ;;  %v630_v8 = vld [vmem:[#allocation5 + $0x90] sm:$0xff]   ;;  %v65_v15 = vunpack.c.l.s4 %v761_v14  ;;  %v68_v21 = vshrl.u32 %v67_v16, 7  ;;  %v762_v43 = vmov 0.0   ;;  %vm763_vm2 = vmmov 0  }
  0x39   :  { %563 = vmatpush3.bf16.msra.mxu0 %v625_v3  ;;  %341 = vmatprep.subr.bf16.mxu1 %v760_v0  ;;  %v631_v9 = vld [vmem:[#allocation5 + $0x10] sm:$0xff]   ;;  %v632_v10 = vld [vmem:[#allocation5 + $0x58] sm:$0xff]   ;;  %v635_v13 = vld [vmem:[#allocation5 + $0x60] sm:$0xff]   ;;  %v493_v2 = vand.u32 127, %v67_v16  ;;  %vm496_vm4 = vcmask 1041408  }
  0x3a   :  { %564 = vmatprep.subr.bf16.mxu0 %v626_v4  ;;  %v633_v11 = vld [vmem:[#allocation5 + $0x98] sm:$0xff]   ;;  %v636_v17 = vld [vmem:[#allocation5 + $0xa0] sm:$0xff]   ;;  %v638_v19 = vld [vmem:[#allocation5 + $0x68] sm:$0xff]   ;;  %v66_v20 = vunpack.c.0.s8 %v65_v15 }
  0x3b   :  { %v634_v12 = vld [vmem:[#allocation5 + $0x18] sm:$0xff]   ;;  %v637_v18 = vld [vmem:[#allocation5 + $0x20] sm:$0xff]   ;;  %v639_v22 = vld [vmem:[#allocation5 + $0xa8] sm:$0xff]   ;;  %vm494_vm3 = vcmp.lt.s32.totalorder %v493_v2, 6 }
  0x3c   :  { %342 = vmatpush1.bf16.msra.mxu1 %v627_v5  ;;  %v640_v23 = vld [vmem:[#allocation5 + $0x28] sm:$0xff]   ;;  %v641_v24 = vld [vmem:[#allocation5 + $0x70] sm:$0xff]   ;;  %v69_v25 = vsub.s32 %v66_v20, %v68_v21  ;;  %v61_v28 = vld [vmem:[#allocation2] sm:$0xff] }
  0x3d   :  { %565 = vmatpush3.bf16.msra.mxu0 %v628_v6  ;;  %343 = vmatprep.subr.bf16.mxu1 %v760_v0  ;;  %v642_v26 = vld [vmem:[#allocation5 + $0xb0] sm:$0xff]   ;;  %v644_v29 = vld [vmem:[#allocation5 + $0x78] sm:$0xff]   ;;  %v63_v30 = vcombine.high %v61_v28, %v61_v28  ;;  %v648_v36 = vld [vmem:[#allocation5 + $0xc0] ss:$0 sps:$4 sm:$0xff]  }
  0x3e   :  { %566 = vmatprep.subr.bf16.mxu0 %v629_v7  ;;  %v643_v27 = vld [vmem:[#allocation5 + $0x30] sm:$0xff]   ;;  %v70_v31 = vrot.slane %v61_v28, %v69_v25  ;;  %v645_v32 = vld [vmem:[#allocation5 + $0xb8] sm:$0xff]   ;;  %v297_v41 = vsel %vm295_vm0, %v648_v36, 0  ;;  %v649_v42 = vld [vmem:[#allocation7] sm:$0xff]  }
  0x3f   :  { %v646_v33 = vld [vmem:[#allocation5 + $0x38] sm:$0xff]   ;;  %v77_v35 = vrot.slane %v63_v30, %v69_v25  ;;  %v650_v45 = vld [vmem:[#allocation7 + $0x8] sm:$0xff]   ;;  %v653_v48 = vld [vmem:[#allocation7 + $0x20] sm:$0xff]  }
  0x40   :  { %344 = vmatpush1.bf16.msra.mxu1 %v630_v8  ;;  %v78_v34 = vcombine.high %v70_v31, %v70_v31  ;;  %v84_v39 = vpack.c.bf16 %v70_v31, %v70_v31  ;;  %v651_v46 = vld [vmem:[#allocation7 + $0x10] sm:$0xff]   ;;  %v652_v47 = vld [vmem:[#allocation7 + $0x18] sm:$0xff]   ;;  %v654_v49 = vld [vmem:[#allocation7 + $0x28] sm:$0xff]  }
  0x41   :  { %567 = vmatpush3.bf16.msra.mxu0 %v631_v9  ;;  %345 = vmatprep.subr.bf16.mxu1 %v760_v0  ;;  %v79_v38 = vcombine.high %v77_v35, %v77_v35  ;;  %v86_v44 = vpack.c.bf16 %v77_v35, %v77_v35  ;;  %v655_v50 = vld [vmem:[#allocation7 + $0x30] sm:$0xff]   ;;  %v656_v51 = vld [vmem:[#allocation7 + $0x38] sm:$0xff]  }
  0x42   :  { %568 = vmatprep.subr.bf16.mxu0 %v632_v10  ;;  %v85_v37 = vpack.c.bf16 %v78_v34, %v78_v34  ;;  %v526_v54 = vld [vmem:[%s868_s2] ss:$0 sm:$0xff]  ;;  %s764_s2 = smov [#allocation8]  }
  0x43   :  { %v87_v40 = vpack.c.bf16 %v79_v38, %v79_v38  ;;  %v553_v3 = vld [vmem:[%s870_s4] ss:$0 sm:$0xff]  ;;  %s516_s4 = sshll.u32 %s764_s2, 4  ;;  %s517_s4 = int_to_ptr.vmem [resolvable:$true] %s516_s4 }
  0x44   :  { %346 = vmatpush1.bf16.msra.mxu1 %v633_v11  ;;  %331 = vmatprep.mubr.bf16.mxu0 %v85_v37  ;;  %s727_s7 = scalar_lea.vmem %s517_s4, 16  ;;  %s731_s8 = scalar_lea.vmem %s517_s4, 32 }
  0x45   :  { %569 = vmatpush3.bf16.msra.mxu0 %v634_v12  ;;  %347 = vmatprep.subr.bf16.mxu1 %v760_v0  ;;  %p728_p10 = scmp.ne.s32.totalorder %s517_s4, %s727_s7  ;;  %p732_p11 = scmp.lt.s32.totalorder %s517_s4, %s517_s4 }
  0x46   :  { %570 = vmatprep.subr.bf16.mxu0 %v635_v13  ;;  %552 = vmatprep.mubr.msk.bf16.mxu1 %vm291_vm1, %v87_v40  ;;  %p733_p12 = scmp.lt.s32.totalorder %s731_s8, %s727_s7 }
  0x48   :  { %348 = vmatpush1.bf16.msra.mxu1 %v636_v17  ;;  %p734_p13 = por %p733_p12, %p732_p11 }
  0x49   :  { %571 = vmatpush3.bf16.msra.mxu0 %v637_v18  ;;  %349 = vmatprep.subr.bf16.mxu1 %v760_v0 }
  0x4a   :  { %572 = vmatprep.subr.bf16.mxu0 %v638_v19  ;;  %p735_p0 = pnand %p734_p13, %p728_p10 }
  0x4c   :  { %350 = vmatpush1.bf16.msra.mxu1 %v639_v22 }
  0x4d   :  { %573 = vmatpush3.bf16.msra.mxu0 %v640_v23  ;;  %351 = vmatprep.subr.bf16.mxu1 %v760_v0 }
  0x4e   :  { %574 = vmatprep.subr.bf16.mxu0 %v641_v24 }
  0x50   :  { %352 = vmatpush1.bf16.msra.mxu1 %v642_v26 }
  0x51   :  { %575 = vmatpush3.bf16.msra.mxu0 %v643_v27  ;;  %353 = vmatprep.subr.bf16.mxu1 %v760_v0 }
  0x52   :  { %576 = vmatprep.subr.bf16.mxu0 %v644_v29 }
  0x54   :  { %354 = vmatpush1.bf16.msra.mxu1 %v645_v32 }
  0x55   :  { %577 = vmatpush3.bf16.msra.mxu0 %v646_v33  ;;  %355 = vmatprep.subr.bf16.mxu1 %v760_v0 }
  0x56   :  { %593 = vmatprep.subr.bf16.mxu0 %v762_v43 }
  0x58   :  { %332 = vmatmul.mubr.bf16.vlgmr.msra.gmra.mrb[0].mxu0 %v84_v39  ;;  %356 = vmatpush1.bf16.msra.mxu1 %v297_v41 }
  0x59   :  { %594 = vmatpush3.bf16.msra.mxu0 %v649_v42  ;;  %609 = vmatprep.mubr.msk.bf16.mxu0 %vm763_vm2, %v762_v43 }
  0x5a   :  { %595 = vmatprep.subr.bf16.mxu0 %v762_v43 }
  0x5b   :  { %372 = vmatmul.mubr.bf16.vlgmr.msra.gmra.mrb[0].mxu1 %v86_v44 }
  0x5d   :  { %596 = vmatpush3.bf16.msra.mxu0 %v650_v45 }
  0x5e   :  { %597 = vmatprep.subr.bf16.mxu0 %v762_v43 }
  0x61   :  { %598 = vmatpush3.bf16.msra.mxu0 %v651_v46 }
  0x62   :  { %599 = vmatprep.subr.bf16.mxu0 %v762_v43 }
  0x65   :  { %600 = vmatpush3.bf16.msra.mxu0 %v652_v47 }
  0x66   :  { %601 = vmatprep.subr.bf16.mxu0 %v762_v43 }
  0x69   :  { %602 = vmatpush3.bf16.msra.mxu0 %v653_v48 }
  0x6a   :  { %603 = vmatprep.subr.bf16.mxu0 %v762_v43 }
  0x6d   :  { %604 = vmatpush3.bf16.msra.mxu0 %v654_v49 }
  0x6e   :  { %605 = vmatprep.subr.bf16.mxu0 %v762_v43 }
  0x71   :  { %606 = vmatpush3.bf16.msra.mxu0 %v655_v50 }
  0x72   :  { %607 = vmatprep.subr.bf16.mxu0 %v762_v43 }
  0x75   :  { %608 = vmatpush3.bf16.msra.mxu0 %v656_v51 }
 0x12b   :  { %v578_v52 = vpop.f32.mrb[0].mxu0 }
 0x12c   :  { %v579_v53 = vpop.f32.mrb[1].mxu0 }
 0x12d   :  { %v580_v55 = vadd.f32 %v579_v53, %v578_v52  ;;  %v581_v56 = vpop.f32.mrb[2].mxu0 }
 0x12e   :  { %v582_v57 = vpop.f32.mrb[3].mxu0  ;;  %v373_v58 = vpop.f32.mrb[0].mxu1 }
 0x12f   :  { %v334_v59 = vadd.f32 %v580_v55, %v526_v54  ;;  %v375_v60 = vpop.f32.mrb[1].mxu1 }
 0x130   :  { %v376_v61 = vpop.f32.mrb[2].mxu1 }
 0x131   :  { %v374_v62 = vadd.f32 %v373_v58, %v334_v59  ;;  %v377_v63 = vpop.f32.mrb[3].mxu1 }
 0x133   :  { %v379_v0 = vmax.f32 %v374_v62, 0.0 }
 0x135   :  { %v380_v1 = vpack.c.bf16 %v379_v0, %v379_v0 }
 0x137   :  { %610 = vmatmul.mubr.bf16.vlgmr.msra.gmra.mrb[4].mxu0 %v380_v1 }
 0x20a   :  { %v486_v4 = vpop.f32.mrb[4].mxu0 }
 0x20b   :  { %v487_v5 = vadd.f32 %v553_v3, %v486_v4  ;;  %v611_v6 = vpop.f32.mrb[5].mxu0 }
 0x20c   :  { %v489_v7 = vpop.f32.mrb[6].mxu0 }
 0x20d   :  { %v612_v8 = vpop.f32.mrb[7].mxu0  ;;  %v495_v9 = vsel %vm494_vm3, %v487_v5, -1e+30 }
 0x20e   :  { %v497_v10 = vsel %vm496_vm4, %v495_v9, -inf }
 0x20f   :  { %498 = vmax.xlane.f32.xlu0 %v497_v10 }
 0x29c   :  { %v499_v11 = vpop.xlane.xlu0 %498 }
 0x29d   :  { %v500_v12 = vsub.f32 %v495_v9, %v499_v11 }
 0x29f   :  { %v501_v13 = vmul.f32 1.442695, %v500_v12 }
 0x2a1   :  { %657 = vpow2.f32 %v501_v13 }
 0x2ab   :  { %v658_v14 = vpop.eup %657 }
 0x2ac   :  { %v503_v15 = vsel %vm496_vm4, %v658_v14, 0.0 }
 0x2ad   :  { %504 = vadd.xlane.f32.xlu0 %v503_v15 }
 0x33a   :  { %v505_v16 = vpop.xlane.xlu0 %504 }
 0x33b   :  { %659 = vrcp.f32 %v505_v16 }
 0x345   :  { %v660_v17 = vpop.eup %659 }
 0x346   :  { %v507_v18 = vmul.f32 %v660_v17, %v658_v14 }
 0x348   :  { %v508_v19 = vpack.c.bf16 %v507_v18, %v507_v18 }
 0x34a   :  { %509 = vst [vmem:[#allocation8] sm:$0x1] %v508_v19 }
 0x34b   :  { %738 = shalt.err (!%p735_p0)
}
 0x34c   :  { %s739_s11 = scalar_lea.hbm %s871_s5, 16 }
 0x34d   :  { %p740_p1 = scmp.ne.s32.totalorder %s871_s5, %s739_s11  ;;  %p743_p2 = scmp.lt.u32.totalorder %s739_s11, %s871_s5 }
 0x34f   :  { %p745_p3 = pnand %p743_p2, %p740_p1 }
 0x351   :  { %748 = shalt.err (!%p745_p3)
}
 0x352   :  { %519 = dma.vmem_to_hbm [thread:$0]  %s517_s4, 16, %s871_s5, [#allocation4]  }
 0x353   :  { %753 = dma.done.wait [#allocation4], 16  }
 0x354   :  { %754 = vsyncadd [#allocation4], 4294967280 }
 0x355   :  { %523 = vsyncpa [#allocation3], 1 }
 0x356   :  { %524 = vsyncpa [#allocation6], 1 }
 0x357   :  { %525 = vsyncpa [#allocation4], 1 }

</bundles_post_ra>
